<compile_context>
chip_gen: v7x
topology: tpu7x:2x2x1
jax: 0.10.0
libtpu: 0.0.40
codegen_flags: <defaults>
</compile_context>

<pallas_src>
import functools

import jax
import jax.numpy as jnp
from jax.experimental import pallas as pl
from jax.experimental.pallas import tpu as pltpu


_VMEM_LIMIT_BYTES = 48 * 1024 * 1024   # raise scoped VMEM; safe on v5e/v6e/v7x
_VMEM_BUDGET_BYTES = 40 * 1024 * 1024  # target working set when auto-sizing tm

_MATMUL_DTYPES = {"float32": jnp.float32, "bfloat16": jnp.bfloat16}
_ITEMSIZE = {"float32": 4, "bfloat16": 2}


def _round_up(n, m):
    return ((n + m - 1) // m) * m


def _cdiv(a, b):
    return (a + b - 1) // b


def _bias_layout(h_dims, y_dim):
    """Pack [b1, ..., bH, b_mu|b_sigma] into one row; segments 128-lane aligned."""
    widths = tuple(list(h_dims) + [2 * y_dim])
    offs = []
    total = 0
    for d in widths:
        offs.append(total)
        total += _round_up(d, 128)
    return tuple(offs), widths, total


def _default_matmul_dtype():
    """bf16 MXU on v6e/v7x; f32 on v5e (no bf16 VPU/EUP) and unknown chips."""
    try:
        kind = jax.devices()[0].device_kind.lower()
    except Exception:
        return "float32"
    if "v6" in kind or "v7" in kind:
        return "bfloat16"
    return "float32"


def _make_kernel(h_dims, y_dim, matmul_dtype):
    """Kernel body for a fixed layer structure (fused mu|sigma head)."""
    n_hidden = len(h_dims)
    offs, widths, _ = _bias_layout(h_dims, y_dim)
    md = _MATMUL_DTYPES[matmul_dtype]

    def kernel(x_ref, b_ref, *refs):
        # refs = [w1, ..., wH, w_head, out]
        w_refs = refs[:n_hidden + 1]
        out_ref = refs[n_hidden + 1]

        h = x_ref[...].astype(md)                               # (tm, d_in)
        for li in range(n_hidden):
            d, off = widths[li], offs[li]
            z = jnp.dot(h, w_refs[li][...],                     # MXU, f32 acc
                        preferred_element_type=jnp.float32)
            z = z + b_ref[:, off:off + d]                       # bias (f32)
            h = jnp.maximum(z, 0.0).astype(md)                  # ReLU -> MXU dtype

        # Fused mu|sigma head: single matmul, single merged output slab.
        d, off = widths[n_hidden], offs[n_hidden]               # d == 2*y_dim
        head = jnp.dot(h, w_refs[n_hidden][...],
                       preferred_element_type=jnp.float32)
        head = head + b_ref[:, off:off + d]                     # (tm, 2*y_dim) f32

        # cols [0, y_dim): mu ; cols [y_dim, 2*y_dim): 0.001 + 0.999*softplus
        col = jax.lax.broadcasted_iota(jnp.int32, head.shape, 1)
        softplus = jnp.logaddexp(head, 0.0)                     # stable softplus
        out_ref[...] = jnp.where(col >= y_dim, 0.001 + 0.999 * softplus, head)

    return kernel


def _decoder_pallas(net_input, weights, bias_packed, h_dims, y_dim, tm_req,
                    matmul_dtype):
    """Run the MLP over all rows of `net_input`; returns merged (mu|sigma)."""
    n_rows, d_in = net_input.shape
    out_w = 2 * y_dim

    # ---- choose the row tile ----
    widths = [d_in] + list(h_dims) + [out_w]
    w_itemsize = _ITEMSIZE[matmul_dtype]
    w_bytes = sum(int(w.size) * w_itemsize for w in weights)
    b_bytes = int(bias_packed.size) * 4

    def vmem_estimate(tm):
        io = 2 * tm * d_in * 4 + 2 * tm * out_w * 4      # double-buffered tiles
        act = 4 * tm * max(widths) * 4                   # activation working set
        return io + act + 2 * (w_bytes + b_bytes)

    n_rows8 = _round_up(n_rows, 8)
    tm = min(_round_up(max(int(tm_req), 8), 8), n_rows8)
    # Prefer >= 2 grid steps so v7x's two TensorCores both get work.
    if n_rows8 >= 16 and tm > _cdiv(n_rows8, 2):
        tm = _round_up(_cdiv(n_rows8, 2), 8)
    while tm > 8 and vmem_estimate(tm) > _VMEM_BUDGET_BYTES:
        tm = max(8, _round_up(tm // 2, 8))

    n_pad = _round_up(n_rows, tm)
    if n_pad != n_rows:
        net_input = jnp.pad(net_input, ((0, n_pad - n_rows), (0, 0)))
    grid = (n_pad // tm,)

    in_specs = [
        pl.BlockSpec((tm, d_in), lambda i: (i, 0)),          # activations
        pl.BlockSpec(bias_packed.shape, lambda i: (0, 0)),   # packed biases
    ]
    for w in weights:                                        # full-extent weights
        in_specs.append(pl.BlockSpec(w.shape, lambda i: (0, 0)))

    out_specs = pl.BlockSpec((tm, out_w), lambda i: (i, 0))
    out_shape = jax.ShapeDtypeStruct((n_pad, out_w), jnp.float32)

    merged = pl.pallas_call(
        _make_kernel(tuple(h_dims), y_dim, matmul_dtype),
        out_shape=out_shape,
        grid_spec=pltpu.PrefetchScalarGridSpec(
            num_scalar_prefetch=0,
            grid=grid,
            in_specs=in_specs,
            out_specs=out_specs,
        ),
        compiler_params=pltpu.CompilerParams(
            dimension_semantics=("parallel",),
            vmem_limit_bytes=_VMEM_LIMIT_BYTES,
        ),
    )(net_input, bias_packed, *weights)
    return merged  # (n_pad, 2*y_dim) f32; rows >= n_rows are padding


@functools.partial(jax.jit, static_argnums=(3, 4, 5, 6))
def _forward_jit(x, z, params, h_dims, y_dim, tm, matmul_dtype):
    md = _MATMUL_DTYPES[matmul_dtype]
    n_hidden = len(h_dims)
    batch, n_points, x_dim = x.shape
    z_dim = z.shape[-1]
    n_rows = batch * n_points

    # Glue (plain JAX): broadcast z over points and build the flat MLP input.
    zb = jnp.broadcast_to(z[:, None, :], (batch, n_points, z_dim))
    net_input = jnp.concatenate(
        [x.reshape(n_rows, x_dim), zb.reshape(n_rows, z_dim)], axis=1
    ).astype(jnp.float32)

    # Weights: hidden layers + fused (mu|sigma) head; cast once for the MXU.
    ws = [params[2 * i].astype(md) for i in range(n_hidden)]
    w_mu, b_mu = params[2 * n_hidden], params[2 * n_hidden + 1]
    w_sg, b_sg = params[2 * n_hidden + 2], params[2 * n_hidden + 3]
    ws.append(jnp.concatenate([w_mu, w_sg], axis=1).astype(md))

    # Biases: pack into one f32 row with 128-aligned segments.
    offs, _, total = _bias_layout(h_dims, y_dim)
    segs = [params[2 * i + 1] for i in range(n_hidden)]
    segs.append(jnp.concatenate([b_mu, b_sg], axis=1))
    bias_packed = jnp.zeros((1, total), jnp.float32)
    for off, seg in zip(offs, segs):
        bias_packed = bias_packed.at[:, off:off + seg.shape[1]].set(
            seg.astype(jnp.float32))

    merged = _decoder_pallas(net_input, ws, bias_packed, h_dims, y_dim, tm,
                             matmul_dtype)

    means = merged[:n_rows, :y_dim].reshape(batch, n_points, y_dim)
    sigmas = merged[:n_rows, y_dim:2 * y_dim].reshape(batch, n_points, y_dim)
    return means, sigmas


def linear_decoder_forward(x, z, params, h_dims, y_dim, tm=1024,
                           matmul_dtype=None):
    """x: (batch, points, x_dim); z: (batch, z_dim) -> (means, sigmas)."""
    if matmul_dtype is None:
        matmul_dtype = _default_matmul_dtype()
    elif not isinstance(matmul_dtype, str):
        matmul_dtype = "bfloat16" if matmul_dtype == jnp.bfloat16 else "float32"
    return _forward_jit(x, z, tuple(params),
                        tuple(int(d) for d in h_dims), int(y_dim), int(tm),
                        matmul_dtype)


def init_params(key, x_dim, z_dim, h_dims, y_dim):
    """Deterministic PyTorch-style (uniform +-1/sqrt(fan_in)) init.

    Layout matches nn.Linear chain: [w1, b1, ..., wH, bH, w_mu, b_mu, w_sg, b_sg].
    """
    dims = [x_dim + z_dim] + list(h_dims)
    params = []
    for i in range(len(h_dims)):
        d_in, d_out = dims[i], dims[i + 1]
        key, kw, kb = jax.random.split(key, 3)
        bound = 1.0 / jnp.sqrt(d_in)
        params.append(jax.random.uniform(kw, (d_in, d_out), jnp.float32, -bound, bound))
        params.append(jax.random.uniform(kb, (1, d_out), jnp.float32, -bound, bound))
    d_h = h_dims[-1]
    for _ in range(2):  # mu head, sigma head
        key, kw, kb = jax.random.split(key, 3)
        bound = 1.0 / jnp.sqrt(d_h)
        params.append(jax.random.uniform(kw, (d_h, y_dim), jnp.float32, -bound, bound))
        params.append(jax.random.uniform(kb, (1, y_dim), jnp.float32, -bound, bound))
    return params


def _reference_forward(x, z, params, h_dims, y_dim):
    """Pure-JAX f32 reference mirroring the PyTorch module."""
    batch, n_points, x_dim = x.shape
    z_dim = z.shape[-1]
    zb = jnp.broadcast_to(z[:, None, :], (batch, n_points, z_dim))
    h = jnp.concatenate(
        [x.reshape(batch * n_points, -1), zb.reshape(batch * n_points, -1)], axis=1
    )
    idx = 0
    for _ in range(len(h_dims)):
        h = jnp.maximum(h @ params[idx] + params[idx + 1], 0.0)
        idx += 2
    mu = h @ params[idx] + params[idx + 1]
    sg = h @ params[idx + 2] + params[idx + 3]
    sg = 0.001 + 0.999 * jnp.logaddexp(sg, 0.0)
    return mu.reshape(batch, n_points, y_dim), sg.reshape(batch, n_points, y_dim)


if __name__ == "__main__":
    # Small shapes consistent with the module's forward signature.
    batch, n_points, x_dim, z_dim, y_dim = 2, 8, 4, 3, 2
    h_dims = [32, 32]

    key = jax.random.PRNGKey(0)
    kx, kz, kp = jax.random.split(key, 3)
    x = jax.random.normal(kx, (batch, n_points, x_dim), jnp.float32)
    z = jax.random.normal(kz, (batch, z_dim), jnp.float32)
    params = init_params(kp, x_dim, z_dim, h_dims, y_dim)

    md = _default_matmul_dtype()
    means, sigmas = linear_decoder_forward(x, z, params, h_dims, y_dim)
    means = jax.block_until_ready(means)
    sigmas = jax.block_until_ready(sigmas)

    ref_means, ref_sigmas = _reference_forward(x, z, params, h_dims, y_dim)
    tol = 1e-5 if md == "float32" else 5e-2  # bf16 MXU path on v6e/v7x
    assert means.shape == (batch, n_points, y_dim)
    assert sigmas.shape == (batch, n_points, y_dim)
    assert jnp.allclose(means, ref_means, atol=tol, rtol=tol)
    assert jnp.allclose(sigmas, ref_sigmas, atol=tol, rtol=tol)
    assert bool(jnp.all(sigmas > 0.0))

    print("KERNEL_OK")
</pallas_src>

<mosaic_0001>
module attributes {stable_mosaic.version = 11 : i64} {
  func.func @kernel(%arg0: i32, %arg1: memref<8x7xf32, #tpu.memory_space<vmem>>, %arg2: memref<1x384xf32, #tpu.memory_space<vmem>>, %arg3: memref<7x32xf32, #tpu.memory_space<vmem>>, %arg4: memref<32x32xf32, #tpu.memory_space<vmem>>, %arg5: memref<32x4xf32, #tpu.memory_space<vmem>>, %arg6: memref<8x4xf32, #tpu.memory_space<vmem>>) attributes {dimension_semantics = [#tpu.dimension_semantics<parallel>], iteration_bounds = array<i64: 2>, scalar_prefetch = 0 : i64, scratch_operands = 0 : i64, tpu.core_type = #tpu.core_type<tc>, window_params = [{transform_indices = @transform_0, window_bounds = array<i64: 8, 7>}, {pipeline_mode = #tpu.pipeline_mode<synchronous>, transform_indices = @transform_1, window_bounds = array<i64: 1, 384>}, {pipeline_mode = #tpu.pipeline_mode<synchronous>, transform_indices = @transform_2, window_bounds = array<i64: 7, 32>}, {pipeline_mode = #tpu.pipeline_mode<synchronous>, transform_indices = @transform_3, window_bounds = array<i64: 32, 32>}, {pipeline_mode = #tpu.pipeline_mode<synchronous>, transform_indices = @transform_4, window_bounds = array<i64: 32, 4>}, {transform_indices = @transform_5, window_bounds = array<i64: 8, 4>}]} {
    %c0 = arith.constant 0 : index
    %c0_0 = arith.constant 0 : index
    %0 = vector.load %arg1[%c0, %c0_0] : memref<8x7xf32, #tpu.memory_space<vmem>>, vector<8x7xf32>
    %c0_1 = arith.constant 0 : index
    %c0_2 = arith.constant 0 : index
    %1 = vector.load %arg3[%c0_1, %c0_2] : memref<7x32xf32, #tpu.memory_space<vmem>>, vector<7x32xf32>
    %cst = arith.constant dense<0.000000e+00> : vector<8x32xf32>
    %2 = tpu.matmul %0, %1, %cst {dimension_numbers = #tpu.dot_dimension_numbers<[1], [0], [0], [1], [0, 0, 1, 1], [], []>} : vector<8x7xf32>, vector<7x32xf32>, vector<8x32xf32> -> vector<8x32xf32>
    %c0_3 = arith.constant 0 : index
    %c0_4 = arith.constant 0 : index
    %3 = vector.load %arg2[%c0_3, %c0_4] : memref<1x384xf32, #tpu.memory_space<vmem>>, vector<1x32xf32>
    %4 = vector.broadcast %3 : vector<1x32xf32> to vector<8x32xf32>
    %5 = arith.addf %2, %4 : vector<8x32xf32>
    %cst_5 = arith.constant 0.000000e+00 : f32
    %6 = vector.broadcast %cst_5 : f32 to vector<8x32xf32>
    %7 = arith.maximumf %5, %6 : vector<8x32xf32>
    %c0_6 = arith.constant 0 : index
    %c0_7 = arith.constant 0 : index
    %8 = vector.load %arg4[%c0_6, %c0_7] : memref<32x32xf32, #tpu.memory_space<vmem>>, vector<32x32xf32>
    %cst_8 = arith.constant dense<0.000000e+00> : vector<8x32xf32>
    %9 = tpu.matmul %7, %8, %cst_8 {dimension_numbers = #tpu.dot_dimension_numbers<[1], [0], [0], [1], [0, 0, 1, 1], [], []>} : vector<8x32xf32>, vector<32x32xf32>, vector<8x32xf32> -> vector<8x32xf32>
    %c0_9 = arith.constant 0 : index
    %c128 = arith.constant 128 : index
    %10 = vector.load %arg2[%c0_9, %c128] : memref<1x384xf32, #tpu.memory_space<vmem>>, vector<1x32xf32>
    %11 = vector.broadcast %10 : vector<1x32xf32> to vector<8x32xf32>
    %12 = arith.addf %9, %11 : vector<8x32xf32>
    %cst_10 = arith.constant 0.000000e+00 : f32
    %13 = vector.broadcast %cst_10 : f32 to vector<8x32xf32>
    %14 = arith.maximumf %12, %13 : vector<8x32xf32>
    %c0_11 = arith.constant 0 : index
    %c0_12 = arith.constant 0 : index
    %15 = vector.load %arg5[%c0_11, %c0_12] : memref<32x4xf32, #tpu.memory_space<vmem>>, vector<32x4xf32>
    %cst_13 = arith.constant dense<0.000000e+00> : vector<8x4xf32>
    %16 = tpu.matmul %14, %15, %cst_13 {dimension_numbers = #tpu.dot_dimension_numbers<[1], [0], [0], [1], [0, 0, 1, 1], [], []>} : vector<8x32xf32>, vector<32x4xf32>, vector<8x4xf32> -> vector<8x4xf32>
    %c0_14 = arith.constant 0 : index
    %c256 = arith.constant 256 : index
    %17 = vector.load %arg2[%c0_14, %c256] : memref<1x384xf32, #tpu.memory_space<vmem>>, vector<1x4xf32>
    %18 = vector.broadcast %17 : vector<1x4xf32> to vector<8x4xf32>
    %19 = arith.addf %16, %18 : vector<8x4xf32>
    %20 = tpu.iota {dimensions = array<i32: 1>} : vector<8x4xi32>
    %cst_15 = arith.constant 0.000000e+00 : f32
    %21 = vector.broadcast %cst_15 : f32 to vector<8x4xf32>
    %22 = arith.maximumf %19, %21 : vector<8x4xf32>
    %23 = vector.broadcast %cst_15 : f32 to vector<8x4xf32>
    %24 = arith.subf %19, %23 : vector<8x4xf32>
    %25 = arith.cmpf one, %24, %24 : vector<8x4xf32>
    %26 = vector.broadcast %cst_15 : f32 to vector<8x4xf32>
    %27 = arith.addf %19, %26 : vector<8x4xf32>
    %28 = math.absf %24 : vector<8x4xf32>
    %cst_16 = arith.constant 0.000000e+00 : f32
    %29 = vector.broadcast %cst_16 : f32 to vector<8x4xf32>
    %30 = arith.subf %29, %28 : vector<8x4xf32>
    %31 = math.exp %30 : vector<8x4xf32>
    %32 = math.log1p %31 : vector<8x4xf32>
    %33 = arith.addf %22, %32 : vector<8x4xf32>
    %34 = arith.select %25, %27, %33 : vector<8x4xi1>, vector<8x4xf32>
    %c2_i32 = arith.constant 2 : i32
    %35 = vector.broadcast %c2_i32 : i32 to vector<8x4xi32>
    %36 = arith.cmpi sge, %20, %35 : vector<8x4xi32>
    %cst_17 = arith.constant 9.990000e-01 : f32
    %37 = vector.broadcast %cst_17 : f32 to vector<8x4xf32>
    %38 = arith.mulf %37, %34 : vector<8x4xf32>
    %cst_18 = arith.constant 1.000000e-03 : f32
    %39 = vector.broadcast %cst_18 : f32 to vector<8x4xf32>
    %40 = arith.addf %39, %38 : vector<8x4xf32>
    %41 = arith.select %36, %40, %19 : vector<8x4xi1>, vector<8x4xf32>
    %c0_19 = arith.constant 0 : index
    %c0_20 = arith.constant 0 : index
    %42 = vector.load %arg6[%c0_19, %c0_20] : memref<8x4xf32, #tpu.memory_space<vmem>>, vector<8x4xf32>
    tpu.vector_store %arg6[%c0_19, %c0_20], %41 {strides = array<i32>} : memref<8x4xf32, #tpu.memory_space<vmem>>, vector<8x4xf32>,
    return
  }
  func.func @transform_0(%arg0: i32) -> (i32, i32) {
    %c0_i32 = arith.constant 0 : i32
    %c0_i32_0 = arith.constant 0 : i32
    return %arg0, %c0_i32 : i32, i32
  }
  func.func @transform_1(%arg0: i32) -> (i32, i32) {
    %c0_i32 = arith.constant 0 : i32
    %c0_i32_0 = arith.constant 0 : i32
    %c0_i32_1 = arith.constant 0 : i32
    return %c0_i32, %c0_i32_0 : i32, i32
  }
  func.func @transform_2(%arg0: i32) -> (i32, i32) {
    %c0_i32 = arith.constant 0 : i32
    %c0_i32_0 = arith.constant 0 : i32
    %c0_i32_1 = arith.constant 0 : i32
    return %c0_i32, %c0_i32_0 : i32, i32
  }
  func.func @transform_3(%arg0: i32) -> (i32, i32) {
    %c0_i32 = arith.constant 0 : i32
    %c0_i32_0 = arith.constant 0 : i32
    %c0_i32_1 = arith.constant 0 : i32
    return %c0_i32, %c0_i32_0 : i32, i32
  }
  func.func @transform_4(%arg0: i32) -> (i32, i32) {
    %c0_i32 = arith.constant 0 : i32
    %c0_i32_0 = arith.constant 0 : i32
    %c0_i32_1 = arith.constant 0 : i32
    return %c0_i32, %c0_i32_0 : i32, i32
  }
  func.func @transform_5(%arg0: i32) -> (i32, i32) {
    %c0_i32 = arith.constant 0 : i32
    %c0_i32_0 = arith.constant 0 : i32
    return %arg0, %c0_i32 : i32, i32
  }
}

</mosaic_0001>

<bundles_post_ra>
// kernel: _forward_jit.1
= control target key start
LH: loop header
LB: loop body
LE: loop exit
PB: predicated region body
PF: predicated region fallthrough
CT: control target
= control target key end

     0   :  { %s680_s18 = smov 0   ;;  %s743_s0 = inlined_call_operand.vmem [shape: f32[16,7], index: 0, kind: input, shape index: {}]   ;;  %s744_s1 = inlined_call_operand.vmem [shape: f32[1,384], index: 1, kind: input, shape index: {}]   ;;  %s745_s2 = inlined_call_operand.vmem [shape: f32[7,32], index: 2, kind: input, shape index: {}]   ;;  %s746_s3 = inlined_call_operand.vmem [shape: f32[32,32], index: 3, kind: input, shape index: {}]   ;;  %s747_s4 = inlined_call_operand.vmem [shape: f32[32,4], index: 4, kind: input, shape index: {}]   ;;  %s748_s5 = inlined_call_operand.vmem [shape: f32[16,4], index: 5, kind: output, shape index: {}]  }
   0x1 LB: > { %s557_s19 = sadd.s32 4294967295, %s645_s18   ;;  %p561_p0 = scmp.ge.s32.totalorder %s645_s18, 1  ;;  %s645_s18 = sphi %s680_s18, %s15_s18  }
   0x2   : > { %p186_p1 = scmp.lt.s32.totalorder %s645_s18, 3 }
   0x4   : > { %p187_p2 = pnand %p561_p0, %p186_p1 }
   0x5   : > { %v221_v0 = vld [vmem:[%s745_s2] sm:$0x7f] (!%p187_p2)  ;;  %vm233_vm0 = vcmask (!%p187_p2), 1046528   ;;  %p212_p3 = scmp.lt.s32.totalorder (!%p187_p2), %s557_s19, 1  ;;  %v647_v1 = vmov (!%p187_p2), 0.0   ;;  %vm648_vm1 = vmmov (!%p187_p2), 0   ;;  %v478_v39 = vlaneseq (!%p187_p2) }
   0x6   : > { %190 = sbr.rel (%p187_p2) target bundleno = 705 (0x2c1), region = 40  ;;  %585 = vmatprep.subr.mxu0 (!%p187_p2), %v647_v1  ;;  %587 = vmatprep.mubr.msk.f32.mxu0 (!%p187_p2), %vm648_vm1, %v647_v1  ;;  %v308_v2 = vld [vmem:[%s746_s3] sm:$0xff] (!%p187_p2)  ;;  %v309_v3 = vld [vmem:[%s746_s3 + $0x8] sm:$0xff] (!%p187_p2)  ;;  %v649_v4 = vmov (!%p187_p2), 0.0|0.0   ;;  %vm229_vm2 = vcmask (!%p187_p2), 56320   ;;  %v310_v7 = vld [vmem:[%s746_s3 + $0x10] sm:$0xff] (!%p187_p2) }
   0x7   : > { %586 = vmatpush3.msk.msra.mxu0 (!%p187_p2), %vm233_vm0, %v221_v0  ;;  %612 = vmatprep.subr.bf16.mxu1 (!%p187_p2), %v649_v4  ;;  %v613_v5 = vpack.c.bf16 (!%p187_p2), %v309_v3, %v308_v2  ;;  %v311_v8 = vld [vmem:[%s746_s3 + $0x18] sm:$0xff] (!%p187_p2)  ;;  %v394_v10 = vld [vmem:[%s747_s4] sm:$0xff] (!%p187_p2)  ;;  %v395_v11 = vld [vmem:[%s747_s4 + $0x8] sm:$0xff] (!%p187_p2)  ;;  %vm319_vm3 = vcmask (!%p187_p2), 261120   ;;  %v479_v44 = vand.u32 (!%p187_p2), 127, %v478_v39  ;;  %vm502_vm7 = vcmask (!%p187_p2), 31744  }
   0x8   : > { %598 = vmatprep.mubr.msk.f32.mxu1 (!%p187_p2), %vm648_vm1, %v647_v1  ;;  %618 = vmatprep.subr.bf16.mxu0 (!%p187_p2), %v649_v4  ;;  %v616_v9 = vpack.c.bf16 (!%p187_p2), %v311_v8, %v310_v7  ;;  %v619_v12 = vpack.c.bf16 (!%p187_p2), %v395_v11, %v394_v10  ;;  %v564_v13 = vld [vmem:[%s744_s1] ss:$0 sm:$0xff] (!%p187_p2)  ;;  %v396_v18 = vld [vmem:[%s747_s4 + $0x10] sm:$0xff] (!%p187_p2)  ;;  %v397_v19 = vld [vmem:[%s747_s4 + $0x18] sm:$0xff] (!%p187_p2) }
   0x9   : > { %614 = vmatpush3.bf16.msra.mxu1 (!%p187_p2), %v613_v5  ;;  %v622_v20 = vpack.c.bf16 (!%p187_p2), %v397_v19, %v396_v18  ;;  %v567_v21 = vld [vmem:[%s744_s1 + $0x1] ss:$0 sm:$0xff] (!%p187_p2)  ;;  %v569_v26 = vld [vmem:[%s744_s1 + $0x2] ss:$0 sm:$0xff] (!%p187_p2)  ;;  %vm498_vm6 = vcmp.ge.s32.totalorder (!%p187_p2), %v479_v44, 2 }
   0xa   : > { %615 = vmatprep.subr.bf16.mxu1 (!%p187_p2), %v649_v4 }
   0xd   : > { %s750_s19 = smov (!%p212_p3, %s557_s19), 1  ;;  %617 = vmatpush3.bf16.msra.mxu1 %v616_v9 }
   0xe   : > { %s562_s26 = sshll.u32 %s750_s19, 3 }
   0xf   : > { %s215_s29 = scalar_lea.vmem %s743_s0, %s562_s26  ;;  %s219_s28 = scalar_lea.vmem %s748_s5, %s562_s26 }
  0x10   : > { %v220_v6 = vld [vmem:[%s215_s29] sm:$0xff] }
  0x11   : > { %588 = vmatmul.mubr.msk.f32.vlgmr.msra.gmra.mrb[0].mxu0 %vm229_vm2, %v220_v6 }
  0x12   : > { %609 = vmatprep.mubr.msk.f32.mxu0 %vm648_vm1, %v647_v1  ;;  %620 = vmatpush3.bf16.msra.mxu0 %v619_v12 }
  0x13   : > { %621 = vmatprep.subr.bf16.mxu0 %v649_v4 }
  0x16   : > { %623 = vmatpush3.bf16.msra.mxu0 %v622_v20 }
  0xe4   : > { %v303_v14 = vpop.f32.mrb[0].mxu0 }
  0xe5   : > { %v304_v15 = vadd.f32 %v564_v13, %v303_v14  ;;  %v589_v16 = vpop.f32.mrb[1].mxu0 }
  0xe7   : > { %v307_v17 = vmax.f32 %v304_v15, 0.0 }
  0xe9   : > { %599 = vmatmul.mubr.msk.f32.vlgmr.msra.gmra.mrb[0].mxu1 %vm319_vm3, %v307_v17 }
 0x1bc   : > { %v389_v22 = vpop.f32.mrb[0].mxu1 }
 0x1bd   : > { %v390_v23 = vadd.f32 %v567_v21, %v389_v22  ;;  %v600_v24 = vpop.f32.mrb[1].mxu1 }
 0x1bf   : > { %v393_v25 = vmax.f32 %v390_v23, 0.0 }
 0x1c1   : > { %610 = vmatmul.mubr.msk.f32.vlgmr.msra.gmra.mrb[2].mxu0 %vm319_vm3, %v393_v25 }
 0x294   : > { %v474_v27 = vpop.f32.mrb[2].mxu0 }
 0x295   : > { %v475_v28 = vadd.f32 %v569_v26, %v474_v27  ;;  %v611_v29 = vpop.f32.mrb[3].mxu0 }
 0x297   : > { %v483_v30 = vand.u32 2147483647, %v475_v28  ;;  %v480_v42 = vmax.f32 %v475_v28, 0.0  ;;  %vm481_vm5 = vcmp.ne.f32.partialorder %v475_v28, %v475_v28 }
 0x299   : > { %v484_v31 = vsub.f32 0.0, %v483_v30 }
 0x29b   : > { %v485_v32 = vmul.f32 1.442695, %v484_v31 }
 0x29d   : > { %635 = vpow2.f32 %v485_v32 }
 0x2a7   : > { %v636_v33 = vpop.eup %635 }
 0x2a8   : > { %v487_v34 = vadd.f32 1.0, %v636_v33  ;;  %v490_v35 = vmul.f32 -0.5, %v636_v33  ;;  %v493_v37 = vand.u32 2147483647, %v636_v33 }
 0x2aa   : > { %637 = vlog2.f32 %v487_v34  ;;  %v491_v36 = vadd.f32 1.0, %v490_v35  ;;  %vm494_vm4 = vcmp.lt.f32.partialorder %v493_v37, 0.0004427343 }
 0x2ac   : > { %v492_v41 = vmul.f32 %v636_v33, %v491_v36 }
 0x2b4   : > { %v638_v38 = vpop.eup %637 }
 0x2b5   : > { %v489_v40 = vmul.f32 0.6931472, %v638_v38 }
 0x2b7   : > { %v495_v43 = vsel %vm494_vm4, %v492_v41, %v489_v40 }
 0x2b8   : > { %v496_v45 = vadd.f32 %v495_v43, %v480_v42 }
 0x2ba   : > { %v497_v46 = vsel %vm481_vm5, %v475_v28, %v496_v45 }
 0x2bb   : > { %v499_v47 = vmul.f32 0.999, %v497_v46 }
 0x2bd   : > { %v500_v48 = vadd.f32 0.001, %v499_v47 }
 0x2bf   : > { %v501_v49 = vsel %vm498_vm6, %v500_v48, %v475_v28 }
 0x2c0   : > { %503 = vst.msk [vmem:[%s219_s28] sm:$0xff] %vm502_vm7, %v501_v49 }
 0x2c1 PF: > { %s15_s18 = sadd.s32 1, %s645_s18  }
 0x2c2   : > { %p12_p4 = scmp.ge.s32.totalorder %s15_s18, 4  }
 0x2c4   :  { %14 = sbr.rel (!%p12_p4) target bundleno = 1 (0x1), region = 70 }

</bundles_post_ra>
